<compile_context>
chip_gen: v7x
topology: tpu7x:2x2x1
jax: 0.10.0
libtpu: 0.0.40
codegen_flags: <defaults>
</compile_context>

<pallas_src>
import jax
import jax.numpy as jnp
from jax.experimental import pallas as pl
from jax.experimental.pallas import tpu as pltpu

H1, H2, H_OUT = 64, 32, 1            # hidden sizes fixed by the module
MAX_TILE_B = 8192                    # upper bound on batch rows per grid step
ROW_ALIGN = 256                      # tile_b alignment (sublane packing + 128-lane output)
X_BUFFER_BUDGET = 24 * 1024 * 1024   # VMEM budget for double-buffered x + intermediates
                                     # (conservative for v7x's 64 MiB physical VMEM)


def _round_up(x, m):
    return ((x + m - 1) // m) * m


def mlp_kernel(x_ref, w1_ref, b1_ref, w2_ref, b2_ref, w3t_ref, b3_ref, o_ref):
    # x_ref : (tile_b, D) native dtype  -> cast to bf16 here (VPU, hidden under DMA)
    # w1    : (D, 64) bf16   b1: (1, 64) f32
    # w2    : (64, 32) bf16  b2: (1, 32) f32
    # w3t   : (1, 32) bf16   b3: (1, 1) f32     (final weight stored transposed)
    # o_ref : (1, tile_b) f32  -- lane-dense output row
    x = x_ref[...].astype(jnp.bfloat16)

    h1 = jnp.dot(x, w1_ref[...], preferred_element_type=jnp.float32) + b1_ref[...]
    h1 = jnp.maximum(h1, 0.0).astype(jnp.bfloat16)

    h2 = jnp.dot(h1, w2_ref[...], preferred_element_type=jnp.float32) + b2_ref[...]
    h2 = jnp.maximum(h2, 0.0)                       # (tile_b, 32) f32

    # Final layer in transposed orientation: (1,32) @ (32,tile_b) -> (1,tile_b).
    # The (tile_b,32)->(32,tile_b) transpose is cheap XLU work (XLU has slack) and
    # makes the whole epilogue (bias, exp, reciprocal, store) lane-dense.
    h2t = h2.T.astype(jnp.bfloat16)                 # (32, tile_b)
    z = jnp.dot(w3t_ref[...], h2t, preferred_element_type=jnp.float32) + b3_ref[...]

    # sigmoid(z) = 1 / (1 + exp(-z)); reciprocal goes to the (otherwise idle) EUP slot.
    o_ref[...] = pl.reciprocal(1.0 + jnp.exp(-z), approx=True)


def mlp_forward(x, params):
    """x: [B, input_dim] (any float dtype; streamed as-is) -> [B, 1] float32."""
    w1, b1, w2, b2, w3t, b3 = params
    B, D = x.shape
    x_bytes = jnp.dtype(x.dtype).itemsize

    # ---- D-aware, VMEM-budget-aware batch tile ------------------------------------
    # Per-row VMEM: 2x double-buffered x row + ~intermediates (h1/h2/out, f32+bf16).
    per_row = 2 * D * x_bytes + 768
    cap = min(MAX_TILE_B,
              max(ROW_ALIGN, (X_BUFFER_BUDGET // per_row) // ROW_ALIGN * ROW_ALIGN))
    # TODO(synk): for extremely wide input_dim (>~12K f32 features) the feature axis
    # itself would need tiling; not needed for this module's typical sizes.
    n_tiles = pl.cdiv(B, cap)
    if B > ROW_ALIGN:
        n_tiles = max(n_tiles, 2)                  # keep both v7x TensorCores busy
    tile_b = min(cap, _round_up(pl.cdiv(B, n_tiles), ROW_ALIGN))
    n_tiles = pl.cdiv(B, tile_b)                   # ragged last tile: no jnp.pad needed

    weight_bytes = (D * H1 + H1 * H2 + H2 * H_OUT) * 2 + (H1 + H2 + H_OUT) * 4
    vmem_needed = (2 * tile_b * D * x_bytes        # double-buffered x blocks
                   + 2 * tile_b * 4                # double-buffered output row
                   + tile_b * 640                  # h1/h2 intermediates (f32 + bf16)
                   + 2 * weight_bytes)
    vmem_limit = int(min(64 * 1024 * 1024, max(32 * 1024 * 1024, 1.5 * vmem_needed)))

    cost = pl.CostEstimate(
        flops=2 * B * (D * H1 + H1 * H2 + H2 * H_OUT),
        transcendentals=2 * B,                     # exp + reciprocal per row
        bytes_accessed=B * D * x_bytes + B * 4 + weight_bytes,
    )

    out = pl.pallas_call(
        mlp_kernel,
        out_shape=jax.ShapeDtypeStruct((1, B), jnp.float32),
        grid=(n_tiles,),
        in_specs=[
            pl.BlockSpec((tile_b, D), lambda i: (i, 0)),   # x: streamed per batch tile
            pl.BlockSpec((D, H1), lambda i: (0, 0)),       # weights/biases: VMEM-resident
            pl.BlockSpec((1, H1), lambda i: (0, 0)),
            pl.BlockSpec((H1, H2), lambda i: (0, 0)),
            pl.BlockSpec((1, H2), lambda i: (0, 0)),
            pl.BlockSpec((1, H2), lambda i: (0, 0)),       # w3t (1, 32)
            pl.BlockSpec((1, H_OUT), lambda i: (0, 0)),    # b3  (1, 1)
        ],
        out_specs=pl.BlockSpec((1, tile_b), lambda i: (0, i)),   # lane-dense output row
        compiler_params=pltpu.CompilerParams(
            dimension_semantics=("parallel",),     # shard batch tiles across cores
            vmem_limit_bytes=vmem_limit,
        ),
        cost_estimate=cost,
    )(x, w1, b1, w2, b2, w3t, b3)

    return out.reshape(B, 1)


def init_params(key, input_dim):
    """Init matching nn.Linear's default U(-1/sqrt(fan_in), +1/sqrt(fan_in)).

    w1, w2 stored as [in, out] bf16; the final weight is stored transposed as
    w3t: [1, 32] bf16 (PyTorch layout) for the transposed last matmul.  Biases are
    [1, out] f32 (b3 is [1, 1]).
    """
    dims = [(input_dim, H1), (H1, H2), (H2, H_OUT)]
    params = []
    for i, (fan_in, fan_out) in enumerate(dims):
        kw, kb = jax.random.split(jax.random.fold_in(key, i))
        bound = 1.0 / jnp.sqrt(float(fan_in))
        w = jax.random.uniform(kw, (fan_in, fan_out), jnp.float32, -bound, bound)
        b = jax.random.uniform(kb, (1, fan_out), jnp.float32, -bound, bound)
        if fan_out == H_OUT:
            w = w.T                                    # store final weight as (1, 32)
        params.extend([w.astype(jnp.bfloat16), b.astype(jnp.float32)])
    return tuple(params)


def ref_forward(x, params):
    """Plain-JAX reference with the same dtype choices as the kernel."""
    w1, b1, w2, b2, w3t, b3 = params
    xb = x.astype(jnp.bfloat16)
    h1 = jnp.dot(xb, w1, preferred_element_type=jnp.float32) + b1
    h1 = jnp.maximum(h1, 0.0).astype(jnp.bfloat16)
    h2 = jnp.dot(h1, w2, preferred_element_type=jnp.float32) + b2
    h2 = jnp.maximum(h2, 0.0).astype(jnp.bfloat16)
    z = jnp.dot(h2, w3t.T, preferred_element_type=jnp.float32) + b3
    return jax.nn.sigmoid(z)


if __name__ == "__main__":
    key = jax.random.PRNGKey(0)
    input_dim = 32
    batch = 8

    k_x, k_p = jax.random.split(key)
    # x stays in its native dtype (f32 here); the kernel casts in-VMEM.
    x = jax.random.normal(k_x, (batch, input_dim), jnp.float32)
    params = init_params(k_p, input_dim)

    fwd = jax.jit(mlp_forward)
    out = jax.block_until_ready(fwd(x, params))

    # sanity: shape and sigmoid range
    assert out.shape == (batch, 1)
    assert bool(jnp.all((out >= 0.0) & (out <= 1.0)))

    # cross-check against a dtype-matched plain-JAX reference
    ref = ref_forward(x, params)
    assert bool(jnp.allclose(out, ref, atol=2e-3, rtol=0.0)), (
        f"max abs diff = {float(jnp.max(jnp.abs(out - ref)))}"
    )

    print("KERNEL_OK")
</pallas_src>

<mosaic_0001>
module attributes {stable_mosaic.version = 11 : i64} {
  func.func @mlp_kernel(%arg0: i32, %arg1: memref<256x32xf32, #tpu.memory_space<vmem>>, %arg2: memref<32x64xbf16, #tpu.memory_space<vmem>>, %arg3: memref<1x64xf32, #tpu.memory_space<vmem>>, %arg4: memref<64x32xbf16, #tpu.memory_space<vmem>>, %arg5: memref<1x32xf32, #tpu.memory_space<vmem>>, %arg6: memref<1x32xbf16, #tpu.memory_space<vmem>>, %arg7: memref<1x1xf32, #tpu.memory_space<vmem>>, %arg8: memref<1x256xf32, #tpu.memory_space<vmem>>) attributes {dimension_semantics = [#tpu.dimension_semantics<parallel>], iteration_bounds = array<i64: 1>, scalar_prefetch = 0 : i64, scratch_operands = 0 : i64, tpu.core_type = #tpu.core_type<tc>, window_params = [{transform_indices = @transform_0, window_bounds = array<i64: 256, 32>}, {pipeline_mode = #tpu.pipeline_mode<synchronous>, transform_indices = @transform_1, window_bounds = array<i64: 32, 64>}, {pipeline_mode = #tpu.pipeline_mode<synchronous>, transform_indices = @transform_2, window_bounds = array<i64: 1, 64>}, {pipeline_mode = #tpu.pipeline_mode<synchronous>, transform_indices = @transform_3, window_bounds = array<i64: 64, 32>}, {pipeline_mode = #tpu.pipeline_mode<synchronous>, transform_indices = @transform_4, window_bounds = array<i64: 1, 32>}, {pipeline_mode = #tpu.pipeline_mode<synchronous>, transform_indices = @transform_5, window_bounds = array<i64: 1, 32>}, {pipeline_mode = #tpu.pipeline_mode<synchronous>, transform_indices = @transform_6, window_bounds = array<i64: 1, 1>}, {transform_indices = @transform_7, window_bounds = array<i64: 1, 256>}]} {
    %c0 = arith.constant 0 : index
    %c0_0 = arith.constant 0 : index
    %0 = vector.load %arg1[%c0, %c0_0] : memref<256x32xf32, #tpu.memory_space<vmem>>, vector<256x32xf32>
    %1 = arith.truncf %0 : vector<256x32xf32> to vector<256x32xbf16>
    %c0_1 = arith.constant 0 : index
    %c0_2 = arith.constant 0 : index
    %2 = vector.load %arg2[%c0_1, %c0_2] : memref<32x64xbf16, #tpu.memory_space<vmem>>, vector<32x64xbf16>
    %cst = arith.constant dense<0.000000e+00> : vector<256x64xf32>
    %3 = tpu.matmul %1, %2, %cst {dimension_numbers = #tpu.dot_dimension_numbers<[1], [0], [0], [1], [0, 0, 1, 1], [], []>} : vector<256x32xbf16>, vector<32x64xbf16>, vector<256x64xf32> -> vector<256x64xf32>
    %c0_3 = arith.constant 0 : index
    %c0_4 = arith.constant 0 : index
    %4 = vector.load %arg3[%c0_3, %c0_4] : memref<1x64xf32, #tpu.memory_space<vmem>>, vector<1x64xf32>
    %5 = vector.broadcast %4 : vector<1x64xf32> to vector<256x64xf32>
    %6 = arith.addf %3, %5 : vector<256x64xf32>
    %cst_5 = arith.constant 0.000000e+00 : f32
    %7 = vector.broadcast %cst_5 : f32 to vector<256x64xf32>
    %8 = arith.maximumf %6, %7 : vector<256x64xf32>
    %9 = arith.truncf %8 : vector<256x64xf32> to vector<256x64xbf16>
    %c0_6 = arith.constant 0 : index
    %c0_7 = arith.constant 0 : index
    %10 = vector.load %arg4[%c0_6, %c0_7] : memref<64x32xbf16, #tpu.memory_space<vmem>>, vector<64x32xbf16>
    %cst_8 = arith.constant dense<0.000000e+00> : vector<256x32xf32>
    %11 = tpu.matmul %9, %10, %cst_8 {dimension_numbers = #tpu.dot_dimension_numbers<[1], [0], [0], [1], [0, 0, 1, 1], [], []>} : vector<256x64xbf16>, vector<64x32xbf16>, vector<256x32xf32> -> vector<256x32xf32>
    %c0_9 = arith.constant 0 : index
    %c0_10 = arith.constant 0 : index
    %12 = vector.load %arg5[%c0_9, %c0_10] : memref<1x32xf32, #tpu.memory_space<vmem>>, vector<1x32xf32>
    %13 = vector.broadcast %12 : vector<1x32xf32> to vector<256x32xf32>
    %14 = arith.addf %11, %13 : vector<256x32xf32>
    %cst_11 = arith.constant 0.000000e+00 : f32
    %15 = vector.broadcast %cst_11 : f32 to vector<256x32xf32>
    %16 = arith.maximumf %14, %15 : vector<256x32xf32>
    %17 = tpu.transpose %16, [1, 0] : vector<256x32xf32> -> vector<32x256xf32>
    %18 = arith.truncf %17 : vector<32x256xf32> to vector<32x256xbf16>
    %c0_12 = arith.constant 0 : index
    %c0_13 = arith.constant 0 : index
    %19 = vector.load %arg6[%c0_12, %c0_13] : memref<1x32xbf16, #tpu.memory_space<vmem>>, vector<1x32xbf16>
    %cst_14 = arith.constant dense<0.000000e+00> : vector<1x256xf32>
    %20 = tpu.matmul %19, %18, %cst_14 {dimension_numbers = #tpu.dot_dimension_numbers<[1], [0], [0], [1], [0, 0, 1, 1], [], []>} : vector<1x32xbf16>, vector<32x256xbf16>, vector<1x256xf32> -> vector<1x256xf32>
    %c0_15 = arith.constant 0 : index
    %c0_16 = arith.constant 0 : index
    %21 = vector.load %arg7[%c0_15, %c0_16] : memref<1x1xf32, #tpu.memory_space<vmem>>, vector<1x1xf32>
    %22 = vector.broadcast %21 : vector<1x1xf32> to vector<1x256xf32>
    %23 = arith.addf %20, %22 : vector<1x256xf32>
    %cst_17 = arith.constant 0.000000e+00 : f32
    %24 = vector.broadcast %cst_17 : f32 to vector<1x256xf32>
    %25 = arith.subf %24, %23 : vector<1x256xf32>
    %26 = math.exp %25 : vector<1x256xf32>
    %cst_18 = arith.constant 1.000000e+00 : f32
    %27 = vector.broadcast %cst_18 : f32 to vector<1x256xf32>
    %28 = arith.addf %27, %26 : vector<1x256xf32>
    %29 = tpu.reciprocal %28 {approx = true} : vector<1x256xf32> -> vector<1x256xf32>
    %c0_19 = arith.constant 0 : index
    %c0_20 = arith.constant 0 : index
    %30 = vector.load %arg8[%c0_19, %c0_20] : memref<1x256xf32, #tpu.memory_space<vmem>>, vector<1x256xf32>
    tpu.vector_store %arg8[%c0_19, %c0_20], %29 {strides = array<i32>} : memref<1x256xf32, #tpu.memory_space<vmem>>, vector<1x256xf32>,
    return
  }
  func.func @transform_0(%arg0: i32) -> (i32, i32) {
    %c0_i32 = arith.constant 0 : i32
    %c0_i32_0 = arith.constant 0 : i32
    return %arg0, %c0_i32 : i32, i32
  }
  func.func @transform_1(%arg0: i32) -> (i32, i32) {
    %c0_i32 = arith.constant 0 : i32
    %c0_i32_0 = arith.constant 0 : i32
    %c0_i32_1 = arith.constant 0 : i32
    return %c0_i32, %c0_i32_0 : i32, i32
  }
  func.func @transform_2(%arg0: i32) -> (i32, i32) {
    %c0_i32 = arith.constant 0 : i32
    %c0_i32_0 = arith.constant 0 : i32
    %c0_i32_1 = arith.constant 0 : i32
    return %c0_i32, %c0_i32_0 : i32, i32
  }
  func.func @transform_3(%arg0: i32) -> (i32, i32) {
    %c0_i32 = arith.constant 0 : i32
    %c0_i32_0 = arith.constant 0 : i32
    %c0_i32_1 = arith.constant 0 : i32
    return %c0_i32, %c0_i32_0 : i32, i32
  }
  func.func @transform_4(%arg0: i32) -> (i32, i32) {
    %c0_i32 = arith.constant 0 : i32
    %c0_i32_0 = arith.constant 0 : i32
    %c0_i32_1 = arith.constant 0 : i32
    return %c0_i32, %c0_i32_0 : i32, i32
  }
  func.func @transform_5(%arg0: i32) -> (i32, i32) {
    %c0_i32 = arith.constant 0 : i32
    %c0_i32_0 = arith.constant 0 : i32
    %c0_i32_1 = arith.constant 0 : i32
    return %c0_i32, %c0_i32_0 : i32, i32
  }
  func.func @transform_6(%arg0: i32) -> (i32, i32) {
    %c0_i32 = arith.constant 0 : i32
    %c0_i32_0 = arith.constant 0 : i32
    %c0_i32_1 = arith.constant 0 : i32
    return %c0_i32, %c0_i32_0 : i32, i32
  }
  func.func @transform_7(%arg0: i32) -> (i32, i32) {
    %c0_i32 = arith.constant 0 : i32
    %c0_i32_0 = arith.constant 0 : i32
    return %c0_i32, %arg0 : i32, i32
  }
}

</mosaic_0001>

<bundles_post_ra>
// kernel: mlp_forward.1
= control target key start
LH: loop header
LB: loop body
LE: loop exit
PB: predicated region body
PF: predicated region fallthrough
CT: control target
= control target key end

     0   :  { %s1357_s0 = inlined_call_operand.vmem [shape: f32[8,32], index: 0, kind: input, shape index: {}]   ;;  %s1358_s1 = inlined_call_operand.vmem [shape: bf16[32,64], index: 1, kind: input, shape index: {}]   ;;  %s1359_s2 = inlined_call_operand.vmem [shape: f32[1,64], index: 2, kind: input, shape index: {}]   ;;  %s1360_s3 = inlined_call_operand.vmem [shape: bf16[64,32], index: 3, kind: input, shape index: {}]   ;;  %s1361_s4 = inlined_call_operand.vmem [shape: f32[1,32], index: 4, kind: input, shape index: {}]   ;;  %s1362_s5 = inlined_call_operand.vmem [shape: bf16[1,32], index: 5, kind: input, shape index: {}]   ;;  %s1363_s6 = inlined_call_operand.<no memory space> [shape: f32[1,1], index: 6, kind: input, shape index: {}]   ;;  %s1364_s7 = inlined_call_operand.hbm [shape: f32[1,8], index: 7, kind: output, shape index: {}]  }
   0x1   :  { %v12_v0 = vstv %s1363_s6 }
   0x2   :  { %13 = vst [vmem:[#allocation2] sm:$0x1] %v12_v0 }
   0x3   :  { %14 = vsyncpa [#allocation4], 0  ;;  %v1022_v1 = vld [vmem:[%s1358_s1] sm:$0xff]   ;;  %v1023_v2 = vld [vmem:[%s1358_s1 + $0x8] sm:$0xff]   ;;  %vm101_vm0 = vcmask 261120   ;;  %vm398_vm1 = vcmask 523264  }
   0x4   :  { %v30_v3 = vld [vmem:[%s1357_s0] sm:$0xff]  ;;  %v31_v4 = vld [vmem:[%s1357_s0 + $0x8] sm:$0xff]  ;;  %889 = vmatprep.subr.bf16.mxu0 %v1022_v1  ;;  %v32_v6 = vld [vmem:[%s1357_s0 + $0x10] sm:$0xff] }
   0x5   :  { %v62_v5 = vpack.c.bf16 %v31_v4, %v30_v3  ;;  %890 = vmatpush3.bf16.msra.mxu0 %v1022_v1  ;;  %v33_v7 = vld [vmem:[%s1357_s0 + $0x18] sm:$0xff]  ;;  %v34_v8 = vld [vmem:[%s1357_s0 + $0x20] sm:$0xff]  ;;  %v35_v9 = vld [vmem:[%s1357_s0 + $0x28] sm:$0xff] }
   0x6   :  { %891 = vmatprep.subr.bf16.mxu0 %v1023_v2  ;;  %v63_v10 = vpack.c.bf16 %v33_v7, %v32_v6  ;;  %v64_v11 = vpack.c.bf16 %v35_v9, %v34_v8  ;;  %v36_v12 = vld [vmem:[%s1357_s0 + $0x30] sm:$0xff]  ;;  %v37_v13 = vld [vmem:[%s1357_s0 + $0x38] sm:$0xff]  ;;  %v38_v14 = vld [vmem:[%s1357_s0 + $0x40] sm:$0xff] }
   0x7   :  { %893 = vmatprep.mubr.msk.bf16.mxu0 %vm101_vm0, %v62_v5  ;;  %v39_v15 = vld [vmem:[%s1357_s0 + $0x48] sm:$0xff]  ;;  %v1024_v16 = vld [vmem:[%s1360_s3] sm:$0xff]   ;;  %v65_v18 = vpack.c.bf16 %v37_v13, %v36_v12  ;;  %v40_v20 = vld [vmem:[%s1357_s0 + $0x50] sm:$0xff] }
   0x8   :  { %v1025_v17 = vld [vmem:[%s1360_s3 + $0x8] sm:$0xff]   ;;  %925 = vmatprep.subr.bf16.mxu1 %v1024_v16  ;;  %v66_v19 = vpack.c.bf16 %v39_v15, %v38_v14  ;;  %v41_v21 = vld [vmem:[%s1357_s0 + $0x58] sm:$0xff]  ;;  %v42_v22 = vld [vmem:[%s1357_s0 + $0x60] sm:$0xff] }
   0x9   :  { %892 = vmatpush3.bf16.msra.mxu0 %v1023_v2  ;;  %926 = vmatpush3.bf16.msra.mxu1 %v1024_v16  ;;  %v43_v23 = vld [vmem:[%s1357_s0 + $0x68] sm:$0xff]  ;;  %v67_v24 = vpack.c.bf16 %v41_v21, %v40_v20  ;;  %v44_v26 = vld [vmem:[%s1357_s0 + $0x70] sm:$0xff]  ;;  %v45_v27 = vld [vmem:[%s1357_s0 + $0x78] sm:$0xff] }
   0xa   :  { %927 = vmatprep.subr.bf16.mxu1 %v1025_v17  ;;  %v68_v25 = vpack.c.bf16 %v43_v23, %v42_v22  ;;  %v46_v28 = vld [vmem:[%s1357_s0 + $0x80] sm:$0xff]  ;;  %v47_v29 = vld [vmem:[%s1357_s0 + $0x88] sm:$0xff]  ;;  %v69_v30 = vpack.c.bf16 %v45_v27, %v44_v26  ;;  %v48_v32 = vld [vmem:[%s1357_s0 + $0x90] sm:$0xff] }
   0xb   :  { %v70_v31 = vpack.c.bf16 %v47_v29, %v46_v28  ;;  %v49_v33 = vld [vmem:[%s1357_s0 + $0x98] sm:$0xff]  ;;  %v50_v34 = vld [vmem:[%s1357_s0 + $0xa0] sm:$0xff]  ;;  %v51_v35 = vld [vmem:[%s1357_s0 + $0xa8] sm:$0xff] }
   0xc   :  { %894 = vmatmul.mubr.msk.bf16.vlgmr.msra.gmra.mrb[0].mxu0 %vm101_vm0, %v63_v10  ;;  %v71_v36 = vpack.c.bf16 %v49_v33, %v48_v32  ;;  %v72_v37 = vpack.c.bf16 %v51_v35, %v50_v34  ;;  %v52_v38 = vld [vmem:[%s1357_s0 + $0xb0] sm:$0xff]  ;;  %v53_v39 = vld [vmem:[%s1357_s0 + $0xb8] sm:$0xff]  ;;  %v54_v40 = vld [vmem:[%s1357_s0 + $0xc0] sm:$0xff] }
   0xd   :  { %897 = vmatprep.mubr.msk.bf16.mxu0 %vm101_vm0, %v64_v11  ;;  %928 = vmatpush3.bf16.msra.mxu1 %v1025_v17  ;;  %v55_v41 = vld [vmem:[%s1357_s0 + $0xc8] sm:$0xff]  ;;  %v73_v42 = vpack.c.bf16 %v53_v39, %v52_v38  ;;  %v56_v44 = vld [vmem:[%s1357_s0 + $0xd0] sm:$0xff]  ;;  %v57_v45 = vld [vmem:[%s1357_s0 + $0xd8] sm:$0xff] }
   0xe   :  { %v74_v43 = vpack.c.bf16 %v55_v41, %v54_v40  ;;  %v58_v46 = vld [vmem:[%s1357_s0 + $0xe0] sm:$0xff]  ;;  %v59_v47 = vld [vmem:[%s1357_s0 + $0xe8] sm:$0xff]  ;;  %v75_v48 = vpack.c.bf16 %v57_v45, %v56_v44  ;;  %v60_v50 = vld [vmem:[%s1357_s0 + $0xf0] sm:$0xff] }
   0xf   :  { %v76_v49 = vpack.c.bf16 %v59_v47, %v58_v46  ;;  %v61_v51 = vld [vmem:[%s1357_s0 + $0xf8] sm:$0xff]  ;;  %v1026_v53 = vld [vmem:[%s1360_s3 + $0x10] sm:$0xff]   ;;  %v1239_v55 = vld [vmem:[%s1359_s2] ss:$0 sm:$0xff] }
  0x10   :  { %v77_v52 = vpack.c.bf16 %v61_v51, %v60_v50  ;;  %929 = vmatprep.subr.bf16.mxu1 %v1026_v53  ;;  %v1027_v54 = vld [vmem:[%s1360_s3 + $0x18] sm:$0xff]  }
  0x11   :  { %930 = vmatpush3.bf16.msra.mxu1 %v1026_v53 }
  0x12   :  { %931 = vmatprep.subr.bf16.mxu1 %v1027_v54 }
  0x14   :  { %898 = vmatmul.mubr.msk.bf16.gmra.mrb[4].mxu0 %vm101_vm0, %v65_v18 }
  0x15   :  { %901 = vmatprep.mubr.msk.bf16.mxu0 %vm101_vm0, %v66_v19  ;;  %932 = vmatpush3.bf16.msra.mxu1 %v1027_v54 }
  0x1c   :  { %902 = vmatmul.mubr.msk.bf16.gmra.mrb[8].mxu0 %vm101_vm0, %v67_v24 }
  0x1d   :  { %905 = vmatprep.mubr.msk.bf16.mxu0 %vm101_vm0, %v68_v25 }
  0x24   :  { %906 = vmatmul.mubr.msk.bf16.gmra.mrb[12].mxu0 %vm101_vm0, %v69_v30 }
  0x25   :  { %909 = vmatprep.mubr.msk.bf16.mxu0 %vm101_vm0, %v70_v31 }
  0x2c   :  { %910 = vmatmul.mubr.msk.bf16.gmra.mrb[16].mxu0 %vm101_vm0, %v71_v36 }
  0x2d   :  { %913 = vmatprep.mubr.msk.bf16.mxu0 %vm101_vm0, %v72_v37 }
  0x34   :  { %914 = vmatmul.mubr.msk.bf16.gmra.mrb[20].mxu0 %vm101_vm0, %v73_v42 }
  0x35   :  { %917 = vmatprep.mubr.msk.bf16.mxu0 %vm101_vm0, %v74_v43 }
  0x3c   :  { %918 = vmatmul.mubr.msk.bf16.gmra.mrb[24].mxu0 %vm101_vm0, %v75_v48 }
  0x3d   :  { %921 = vmatprep.mubr.msk.bf16.mxu0 %vm101_vm0, %v76_v49 }
  0x44   :  { %922 = vmatmul.mubr.msk.bf16.gmra.mrb[28].mxu0 %vm101_vm0, %v77_v52 }
  0xdf   :  { %v895_v56 = vpop.f32.mrb[0].mxu0 }
  0xe0   :  { %v193_v57 = vadd.f32 %v895_v56, %v1239_v55  ;;  %v184_v58 = vpop.f32.mrb[1].mxu0 }
  0xe1   :  { %v185_v59 = vadd.f32 %v1239_v55, %v184_v58  ;;  %v896_v60 = vpop.f32.mrb[2].mxu0 }
  0xe2   :  { %v196_v61 = vadd.f32 %v896_v60, %v1239_v55  ;;  %v187_v62 = vpop.f32.mrb[3].mxu0  ;;  %v313_v0 = vmax.f32 %v193_v57, 0.0 }
  0xe3   :  { %v188_v63 = vadd.f32 %v1239_v55, %v187_v62  ;;  %v311_v2 = vmax.f32 %v185_v59, 0.0 }
  0xe4   :  { %v314_v1 = vmax.f32 %v196_v61, 0.0 }
  0xe5   :  { %v312_v3 = vmax.f32 %v188_v63, 0.0 }
  0xe6   :  { %v344_v4 = vpack.c.bf16 %v314_v1, %v313_v0 }
  0xe7   :  { %v899_v5 = vpop.f32.mrb[4].mxu0  ;;  %v343_v6 = vpack.c.bf16 %v312_v3, %v311_v2 }
  0xe8   :  { %v209_v7 = vadd.f32 %v899_v5, %v1239_v55  ;;  %v200_v8 = vpop.f32.mrb[5].mxu0 }
  0xe9   :  { %v201_v9 = vadd.f32 %v1239_v55, %v200_v8  ;;  %v900_v10 = vpop.f32.mrb[6].mxu0  ;;  %933 = vmatprep.mubr.msk.bf16.mxu1 %vm398_vm1, %v343_v6 }
  0xea   :  { %v212_v11 = vadd.f32 %v900_v10, %v1239_v55  ;;  %v203_v12 = vpop.f32.mrb[7].mxu0  ;;  %934 = vmatmul.mubr.msk.bf16.vlgmr.msra.gmra.mrb[0].mxu1 %vm398_vm1, %v344_v4  ;;  %v317_v14 = vmax.f32 %v209_v7, 0.0 }
  0xeb   :  { %v204_v13 = vadd.f32 %v1239_v55, %v203_v12  ;;  %v315_v16 = vmax.f32 %v201_v9, 0.0 }
  0xec   :  { %v318_v15 = vmax.f32 %v212_v11, 0.0 }
  0xed   :  { %v316_v17 = vmax.f32 %v204_v13, 0.0 }
  0xee   :  { %v346_v18 = vpack.c.bf16 %v318_v15, %v317_v14 }
  0xef   :  { %v345_v19 = vpack.c.bf16 %v316_v17, %v315_v16  ;;  %v903_v20 = vpop.f32.mrb[8].mxu0 }
  0xf0   :  { %v225_v21 = vadd.f32 %v903_v20, %v1239_v55  ;;  %v216_v22 = vpop.f32.mrb[9].mxu0 }
  0xf1   :  { %v217_v23 = vadd.f32 %v1239_v55, %v216_v22  ;;  %v904_v24 = vpop.f32.mrb[10].mxu0  ;;  %937 = vmatprep.mubr.msk.bf16.mxu1 %vm398_vm1, %v345_v19 }
  0xf2   :  { %v228_v25 = vadd.f32 %v904_v24, %v1239_v55  ;;  %v219_v26 = vpop.f32.mrb[11].mxu0  ;;  %938 = vmatmul.mubr.msk.bf16.gmra.mrb[4].mxu1 %vm398_vm1, %v346_v18  ;;  %v321_v28 = vmax.f32 %v225_v21, 0.0 }
  0xf3   :  { %v220_v27 = vadd.f32 %v1239_v55, %v219_v26  ;;  %v319_v30 = vmax.f32 %v217_v23, 0.0 }
  0xf4   :  { %v322_v29 = vmax.f32 %v228_v25, 0.0 }
  0xf5   :  { %v320_v31 = vmax.f32 %v220_v27, 0.0 }
  0xf6   :  { %v348_v32 = vpack.c.bf16 %v322_v29, %v321_v28 }
  0xf7   :  { %v347_v33 = vpack.c.bf16 %v320_v31, %v319_v30  ;;  %v907_v34 = vpop.f32.mrb[12].mxu0 }
  0xf8   :  { %v241_v35 = vadd.f32 %v907_v34, %v1239_v55  ;;  %v232_v36 = vpop.f32.mrb[13].mxu0 }
  0xf9   :  { %v233_v37 = vadd.f32 %v1239_v55, %v232_v36  ;;  %v908_v38 = vpop.f32.mrb[14].mxu0  ;;  %941 = vmatprep.mubr.msk.bf16.mxu1 %vm398_vm1, %v347_v33 }
  0xfa   :  { %v244_v39 = vadd.f32 %v908_v38, %v1239_v55  ;;  %v235_v40 = vpop.f32.mrb[15].mxu0  ;;  %942 = vmatmul.mubr.msk.bf16.gmra.mrb[8].mxu1 %vm398_vm1, %v348_v32  ;;  %v325_v42 = vmax.f32 %v241_v35, 0.0 }
  0xfb   :  { %v236_v41 = vadd.f32 %v1239_v55, %v235_v40  ;;  %v323_v44 = vmax.f32 %v233_v37, 0.0 }
  0xfc   :  { %v326_v43 = vmax.f32 %v244_v39, 0.0 }
  0xfd   :  { %v324_v45 = vmax.f32 %v236_v41, 0.0 }
  0xfe   :  { %v350_v46 = vpack.c.bf16 %v326_v43, %v325_v42 }
  0xff   :  { %v349_v47 = vpack.c.bf16 %v324_v45, %v323_v44  ;;  %v911_v48 = vpop.f32.mrb[16].mxu0 }
 0x100   :  { %v257_v49 = vadd.f32 %v911_v48, %v1239_v55  ;;  %v248_v50 = vpop.f32.mrb[17].mxu0 }
 0x101   :  { %v249_v51 = vadd.f32 %v1239_v55, %v248_v50  ;;  %v912_v52 = vpop.f32.mrb[18].mxu0  ;;  %945 = vmatprep.mubr.msk.bf16.mxu1 %vm398_vm1, %v349_v47 }
 0x102   :  { %v260_v53 = vadd.f32 %v912_v52, %v1239_v55  ;;  %v251_v54 = vpop.f32.mrb[19].mxu0  ;;  %946 = vmatmul.mubr.msk.bf16.gmra.mrb[12].mxu1 %vm398_vm1, %v350_v46  ;;  %v329_v57 = vmax.f32 %v257_v49, 0.0 }
 0x103   :  { %v252_v56 = vadd.f32 %v1239_v55, %v251_v54  ;;  %v327_v59 = vmax.f32 %v249_v51, 0.0 }
 0x104   :  { %v330_v58 = vmax.f32 %v260_v53, 0.0 }
 0x105   :  { %v328_v60 = vmax.f32 %v252_v56, 0.0 }
 0x106   :  { %v352_v61 = vpack.c.bf16 %v330_v58, %v329_v57  ;;  %v1302_v57 = vld [vmem:[%s1361_s4] ss:$0 sm:$0xff] }
 0x107   :  { %v351_v62 = vpack.c.bf16 %v328_v60, %v327_v59  ;;  %v915_v63 = vpop.f32.mrb[20].mxu0 }
 0x108   :  { %v273_v0 = vadd.f32 %v915_v63, %v1239_v55  ;;  %v264_v1 = vpop.f32.mrb[21].mxu0 }
 0x109   :  { %v265_v2 = vadd.f32 %v1239_v55, %v264_v1  ;;  %v916_v3 = vpop.f32.mrb[22].mxu0  ;;  %949 = vmatprep.mubr.msk.bf16.mxu1 %vm398_vm1, %v351_v62 }
 0x10a   :  { %v333_v4 = vmax.f32 %v273_v0, 0.0  ;;  %v276_v5 = vadd.f32 %v916_v3, %v1239_v55  ;;  %v267_v6 = vpop.f32.mrb[23].mxu0  ;;  %950 = vmatmul.mubr.msk.bf16.gmra.mrb[16].mxu1 %vm398_vm1, %v352_v61 }
 0x10b   :  { %v331_v7 = vmax.f32 %v265_v2, 0.0  ;;  %v268_v8 = vadd.f32 %v1239_v55, %v267_v6 }
 0x10c   :  { %v334_v9 = vmax.f32 %v276_v5, 0.0 }
 0x10d   :  { %v332_v10 = vmax.f32 %v268_v8, 0.0 }
 0x10e   :  { %v354_v11 = vpack.c.bf16 %v334_v9, %v333_v4 }
 0x10f   :  { %v353_v12 = vpack.c.bf16 %v332_v10, %v331_v7  ;;  %v919_v13 = vpop.f32.mrb[24].mxu0 }
 0x110   :  { %v289_v14 = vadd.f32 %v919_v13, %v1239_v55  ;;  %v280_v15 = vpop.f32.mrb[25].mxu0 }
 0x111   :  { %v281_v16 = vadd.f32 %v1239_v55, %v280_v15  ;;  %v920_v17 = vpop.f32.mrb[26].mxu0  ;;  %953 = vmatprep.mubr.msk.bf16.mxu1 %vm398_vm1, %v353_v12 }
 0x112   :  { %v337_v18 = vmax.f32 %v289_v14, 0.0  ;;  %v292_v19 = vadd.f32 %v920_v17, %v1239_v55  ;;  %v283_v20 = vpop.f32.mrb[27].mxu0  ;;  %954 = vmatmul.mubr.msk.bf16.gmra.mrb[20].mxu1 %vm398_vm1, %v354_v11 }
 0x113   :  { %v335_v21 = vmax.f32 %v281_v16, 0.0  ;;  %v284_v22 = vadd.f32 %v1239_v55, %v283_v20 }
 0x114   :  { %v338_v23 = vmax.f32 %v292_v19, 0.0 }
 0x115   :  { %v336_v24 = vmax.f32 %v284_v22, 0.0 }
 0x116   :  { %v356_v25 = vpack.c.bf16 %v338_v23, %v337_v18 }
 0x117   :  { %v355_v26 = vpack.c.bf16 %v336_v24, %v335_v21  ;;  %v923_v27 = vpop.f32.mrb[28].mxu0 }
 0x118   :  { %v305_v28 = vadd.f32 %v923_v27, %v1239_v55  ;;  %v296_v29 = vpop.f32.mrb[29].mxu0 }
 0x119   :  { %v297_v30 = vadd.f32 %v1239_v55, %v296_v29  ;;  %v924_v31 = vpop.f32.mrb[30].mxu0  ;;  %957 = vmatprep.mubr.msk.bf16.mxu1 %vm398_vm1, %v355_v26 }
 0x11a   :  { %v341_v32 = vmax.f32 %v305_v28, 0.0  ;;  %v308_v33 = vadd.f32 %v924_v31, %v1239_v55  ;;  %v299_v34 = vpop.f32.mrb[31].mxu0  ;;  %958 = vmatmul.mubr.msk.bf16.gmra.mrb[24].mxu1 %vm398_vm1, %v356_v25 }
 0x11b   :  { %v339_v35 = vmax.f32 %v297_v30, 0.0  ;;  %v300_v36 = vadd.f32 %v1239_v55, %v299_v34 }
 0x11c   :  { %v342_v37 = vmax.f32 %v308_v33, 0.0 }
 0x11d   :  { %v340_v38 = vmax.f32 %v300_v36, 0.0 }
 0x11e   :  { %v358_v39 = vpack.c.bf16 %v342_v37, %v341_v32 }
 0x11f   :  { %v357_v40 = vpack.c.bf16 %v340_v38, %v339_v35 }
 0x121   :  { %961 = vmatprep.mubr.msk.bf16.mxu1 %vm398_vm1, %v357_v40 }
 0x122   :  { %962 = vmatmul.mubr.msk.bf16.gmra.mrb[28].mxu1 %vm398_vm1, %v358_v39 }
 0x1bd   :  { %v935_v41 = vpop.f32.mrb[0].mxu1 }
 0x1be   :  { %v481_v42 = vpop.f32.mrb[1].mxu1  ;;  %v490_v58 = vadd.f32 %v935_v41, %v1302_v57 }
 0x1bf   :  { %v936_v43 = vpop.f32.mrb[2].mxu1  ;;  %v482_v59 = vadd.f32 %v1302_v57, %v481_v42 }
 0x1c0   :  { %v484_v44 = vpop.f32.mrb[3].mxu1  ;;  %v493_v61 = vadd.f32 %v936_v43, %v1302_v57  ;;  %v610_v3 = vmax.f32 %v490_v58, 0.0 }
 0x1c1   :  { %v485_v0 = vadd.f32 %v1302_v57, %v484_v44  ;;  %v608_v7 = vmax.f32 %v482_v59, 0.0 }
 0x1c2   :  { %v611_v10 = vmax.f32 %v493_v61, 0.0 }
 0x1c3   :  { %v609_v13 = vmax.f32 %v485_v0, 0.0 }
 0x1c5   :  { %v939_v45 = vpop.f32.mrb[4].mxu1 }
 0x1c6   :  { %v497_v46 = vpop.f32.mrb[5].mxu1  ;;  %v506_v16 = vadd.f32 %v939_v45, %v1302_v57 }
 0x1c7   :  { %v940_v47 = vpop.f32.mrb[6].mxu1  ;;  %v498_v18 = vadd.f32 %v1302_v57, %v497_v46 }
 0x1c8   :  { %v500_v48 = vpop.f32.mrb[7].mxu1  ;;  %v509_v21 = vadd.f32 %v940_v47, %v1302_v57  ;;  %v614_v27 = vmax.f32 %v506_v16, 0.0 }
 0x1c9   :  { %v501_v24 = vadd.f32 %v1302_v57, %v500_v48  ;;  %v612_v31 = vmax.f32 %v498_v18, 0.0  ;;  %v1060_v18 = vmov 0  }
 0x1ca   :  { %v615_v34 = vmax.f32 %v509_v21, 0.0  ;;  %754 = vmatprep.mubr.bf16.mxu0 %v1060_v18  ;;  %1020 = vset.pattern.permute.xlu1 %v1060_v18 }
 0x1cb   :  { %v613_v37 = vmax.f32 %v501_v24, 0.0 }
 0x1cd   :  { %v943_v49 = vpop.f32.mrb[8].mxu1 }
 0x1ce   :  { %v513_v50 = vpop.f32.mrb[9].mxu1  ;;  %v522_v40 = vadd.f32 %v943_v49, %v1302_v57 }
 0x1cf   :  { %v944_v51 = vpop.f32.mrb[10].mxu1  ;;  %v514_v42 = vadd.f32 %v1302_v57, %v513_v50 }
 0x1d0   :  { %v1289_v55 = vpop.f32.mrb[11].mxu1  ;;  %v525_v45 = vadd.f32 %v944_v51, %v1302_v57 }
 0x1d1   :  { %v517_v48 = vadd.f32 %v1302_v57, %v1289_v55  ;;  %v616_v50 = vmax.f32 %v514_v42, 0.0 }
 0x1d2   :  { %v619_v51 = vmax.f32 %v525_v45, 0.0  ;;  %v715_v45 = vlaneseq }
 0x1d4   :  { %vm793_vm2 = vcmp.lt.s32.totalorder %v715_v45, 256 }
 0x1d5   :  { %v1291_v52 = vpop.f32.mrb[12].mxu1 }
 0x1d6   :  { %v1293_v53 = vpop.f32.mrb[13].mxu1  ;;  %v538_v55 = vadd.f32 %v1291_v52, %v1302_v57 }
 0x1d7   :  { %v1295_v54 = vpop.f32.mrb[14].mxu1 }
 0x1d8   :  { %v1297_v56 = vpop.f32.mrb[15].mxu1  ;;  %v622_v52 = vmax.f32 %v538_v55, 0.0  ;;  %v1061_v55 = vmov 1966171168  }
 0x1dd   :  { %v951_v60 = vpop.f32.mrb[16].mxu1 }
 0x1de   :  { %v554_v62 = vadd.f32 %v951_v60, %v1302_v57  ;;  %v545_v63 = vpop.f32.mrb[17].mxu1  ;;  %v618_v60 = vmax.f32 %v522_v40, 0.0 }
 0x1df   :  { %v546_v1 = vadd.f32 %v1302_v57, %v545_v63  ;;  %v952_v2 = vpop.f32.mrb[18].mxu1 }
 0x1e0   :  { %v626_v4 = vmax.f32 %v554_v62, 0.0  ;;  %v557_v5 = vadd.f32 %v952_v2, %v1302_v57  ;;  %v548_v6 = vpop.f32.mrb[19].mxu1 }
 0x1e1   :  { %v624_v8 = vmax.f32 %v546_v1, 0.0  ;;  %v549_v9 = vadd.f32 %v1302_v57, %v548_v6 }
 0x1e2   :  { %v627_v11 = vmax.f32 %v557_v5, 0.0  ;;  %v972_v12 = vpack.i.bf16 %v610_v3, %v626_v4  ;;  %v617_v3 = vmax.f32 %v517_v48, 0.0 }
 0x1e3   :  { %v625_v14 = vmax.f32 %v549_v9, 0.0  ;;  %v968_v15 = vpack.i.bf16 %v608_v7, %v624_v8  ;;  %v530_v7 = vadd.f32 %v1302_v57, %v1293_v53 }
 0x1e4   :  { %v974_v17 = vpack.i.bf16 %v611_v10, %v627_v11  ;;  %v541_v10 = vadd.f32 %v1295_v54, %v1302_v57 }
 0x1e5   :  { %v955_v19 = vpop.f32.mrb[20].mxu1  ;;  %969 = vxpose.xlu0.b32.start [1/16] (narrow) %v968_v15, 32  ;;  %v970_v20 = vpack.i.bf16 %v609_v13, %v625_v14  ;;  %v533_v13 = vadd.f32 %v1302_v57, %v1297_v56  ;;  %v709_v56 = vld [vmem:[#allocation2] sm:$0x1] }
 0x1e6   :  { %v570_v22 = vadd.f32 %v955_v19, %v1302_v57  ;;  %v561_v23 = vpop.f32.mrb[21].mxu1  ;;  %v620_v19 = vmax.f32 %v530_v7, 0.0  ;;  %v623_v21 = vmax.f32 %v541_v10, 0.0  ;;  %712 = vperm.xlu1 %1020, %v709_v56  }
 0x1e7   :  { %v562_v25 = vadd.f32 %v1302_v57, %v561_v23  ;;  %v956_v26 = vpop.f32.mrb[22].mxu1  ;;  %v621_v24 = vmax.f32 %v533_v13, 0.0 }
 0x1e8   :  { %v630_v28 = vmax.f32 %v570_v22, 0.0  ;;  %v573_v29 = vadd.f32 %v956_v26, %v1302_v57  ;;  %v564_v30 = vpop.f32.mrb[23].mxu1 }
 0x1e9   :  { %v628_v32 = vmax.f32 %v562_v25, 0.0  ;;  %v565_v33 = vadd.f32 %v1302_v57, %v564_v30  ;;  %971 = vxpose.xlu0.b32.cont [2/16] (narrow) %v970_v20, 32 }
 0x1ea   :  { %v631_v35 = vmax.f32 %v573_v29, 0.0  ;;  %v980_v36 = vpack.i.bf16 %v614_v27, %v630_v28 }
 0x1eb   :  { %v629_v38 = vmax.f32 %v565_v33, 0.0  ;;  %v976_v39 = vpack.i.bf16 %v612_v31, %v628_v32 }
 0x1ec   :  { %v982_v41 = vpack.i.bf16 %v615_v34, %v631_v35 }
 0x1ed   :  { %v959_v43 = vpop.f32.mrb[24].mxu1  ;;  %973 = vxpose.xlu0.b32.cont [3/16] (narrow) %v972_v12, 32  ;;  %v978_v44 = vpack.i.bf16 %v613_v37, %v629_v38 }
 0x1ee   :  { %v586_v46 = vadd.f32 %v959_v43, %v1302_v57  ;;  %v577_v47 = vpop.f32.mrb[25].mxu1 }
 0x1ef   :  { %v578_v58 = vadd.f32 %v1302_v57, %v577_v47  ;;  %v960_v59 = vpop.f32.mrb[26].mxu1 }
 0x1f0   :  { %v634_v61 = vmax.f32 %v586_v46, 0.0  ;;  %v589_v49 = vadd.f32 %v960_v59, %v1302_v57  ;;  %v580_v62 = vpop.f32.mrb[27].mxu1  ;;  %v716_v46 = vshrl.u32 %v715_v45, 7 }
 0x1f1   :  { %v632_v63 = vmax.f32 %v578_v58, 0.0  ;;  %v581_v0 = vadd.f32 %v1302_v57, %v580_v62  ;;  %975 = vxpose.xlu0.b32.cont [4/16] (narrow) %v974_v17, 32 }
 0x1f2   :  { %v635_v1 = vmax.f32 %v589_v49, 0.0  ;;  %v988_v2 = vpack.i.bf16 %v618_v60, %v634_v61  ;;  %v717_v47 = vsub.s32 0, %v716_v46 }
 0x1f3   :  { %v633_v4 = vmax.f32 %v581_v0, 0.0  ;;  %v984_v5 = vpack.i.bf16 %v616_v50, %v632_v63 }
 0x1f4   :  { %v990_v6 = vpack.i.bf16 %v619_v51, %v635_v1 }
 0x1f5   :  { %v963_v8 = vpop.f32.mrb[28].mxu1  ;;  %977 = vxpose.xlu0.b32.cont [5/16] (narrow) %v976_v39, 32  ;;  %v986_v9 = vpack.i.bf16 %v617_v3, %v633_v4 }
 0x1f6   :  { %v602_v11 = vadd.f32 %v963_v8, %v1302_v57  ;;  %v593_v12 = vpop.f32.mrb[29].mxu1 }
 0x1f7   :  { %v594_v14 = vadd.f32 %v1302_v57, %v593_v12  ;;  %v964_v15 = vpop.f32.mrb[30].mxu1 }
 0x1f8   :  { %v638_v16 = vmax.f32 %v602_v11, 0.0  ;;  %v605_v17 = vadd.f32 %v964_v15, %v1302_v57  ;;  %v596_v53 = vpop.f32.mrb[31].mxu1 }
 0x1f9   :  { %v636_v20 = vmax.f32 %v594_v14, 0.0  ;;  %v597_v54 = vadd.f32 %v1302_v57, %v596_v53  ;;  %979 = vxpose.xlu0.b32.cont [6/16] (narrow) %v978_v44, 32  ;;  %v708_v44 = vld [vmem:[%s1362_s5] sm:$0x1] }
 0x1fa   :  { %v639_v22 = vmax.f32 %v605_v17, 0.0  ;;  %v996_v23 = vpack.i.bf16 %v622_v52, %v638_v16 }
 0x1fb   :  { %v637_v25 = vmax.f32 %v597_v54, 0.0  ;;  %v992_v26 = vpack.i.bf16 %v620_v19, %v636_v20 }
 0x1fc   :  { %v998_v27 = vpack.i.bf16 %v623_v21, %v639_v22 }
 0x1fd   :  { %981 = vxpose.xlu0.b32.cont [7/16] (narrow) %v980_v36, 32  ;;  %v994_v28 = vpack.i.bf16 %v621_v24, %v637_v25 }
 0x201   :  { %983 = vxpose.xlu0.b32.cont [8/16] (narrow) %v982_v41, 32 }
 0x205   :  { %985 = vxpose.xlu0.b32.cont [9/16] (narrow) %v984_v5, 32 }
 0x209   :  { %987 = vxpose.xlu0.b32.cont [10/16] (narrow) %v986_v9, 32 }
 0x20d   :  { %989 = vxpose.xlu0.b32.cont [11/16] (narrow) %v988_v2, 32 }
 0x211   :  { %991 = vxpose.xlu0.b32.cont [12/16] (narrow) %v990_v6, 32  ;;  %v777_v6 = vunpack.c.l.s4 %v1061_v55 }
 0x213   :  { %v778_v7 = vunpack.c.0.s8 %v777_v6 }
 0x215   :  { %993 = vxpose.xlu0.b32.cont [13/16] (narrow) %v992_v26, 32  ;;  %v781_v9 = vsub.s32 %v778_v7, %v716_v46 }
 0x219   :  { %995 = vxpose.xlu0.b32.cont [14/16] (narrow) %v994_v28, 32 }
 0x21d   :  { %997 = vxpose.xlu0.b32.cont [15/16] (narrow) %v996_v23, 32 }
 0x221   :  { %999 = vxpose.xlu0.b32.end [16/16] (narrow) %v998_v27, 32 }
 0x24a   :  { %1021 = vset.pattern.permute.xlu0 %v1060_v18 }
 0x265   :  { %v1000_v57 = vpop.trf.xlu0  ;;  %v713_v48 = vpop.permute.xlu1 %712 }
 0x266   :  { %v1004_v29 = vunpack.i.h.bf16 %v1000_v57  ;;  %v1001_v30 = vunpack.i.l.bf16 %v1000_v57  ;;  %v718_v58 = vrot.slane %v713_v48, %v717_v47 }
 0x269   :  { %v1005_v31 = vpop.trf.xlu0 }
 0x26a   :  { %v1009_v32 = vunpack.i.h.bf16 %v1005_v31  ;;  %v1006_v33 = vunpack.i.l.bf16 %v1005_v31 }
 0x26c   :  { %v705_v34 = vpack.c.bf16 %v1006_v33, %v1001_v30  ;;  %v704_v35 = vpack.c.bf16 %v1009_v32, %v1004_v29 }
 0x26d   :  { %v1010_v36 = vpop.trf.xlu0 }
 0x26e   :  { %722 = vmatprep.subr.bf16.mxu0 %v705_v34  ;;  %v1014_v37 = vunpack.i.h.bf16 %v1010_v36  ;;  %v1011_v38 = vunpack.i.l.bf16 %v1010_v36 }
 0x26f   :  { %723 = vmatpush1.bf16.msra.mxu0 %v704_v35 }
 0x271   :  { %v1015_v39 = vpop.trf.xlu0 }
 0x272   :  { %v1019_v40 = vunpack.i.h.bf16 %v1015_v39  ;;  %v1016_v41 = vunpack.i.l.bf16 %v1015_v39 }
 0x274   :  { %v706_v42 = vpack.c.bf16 %v1019_v40, %v1014_v37  ;;  %v707_v43 = vpack.c.bf16 %v1016_v41, %v1011_v38 }
 0x276   :  { %724 = vmatprep.subr.bf16.mxu0 %v707_v43 }
 0x277   :  { %725 = vmatpush1.bf16.msra.mxu0 %v706_v42 }
 0x27a   :  { %850 = vmatmul.mubr.msk.bf16.vlgmr.msra.gmra.mrb[32].mxu0 %vm101_vm0, %v708_v44 }
 0x34d   :  { %v756_v59 = vpop.f32.mrb[32].mxu0 }
 0x34e   :  { %v757_v60 = vadd.f32 %v756_v59, %v718_v58  ;;  %v758_v61 = vpop.f32.mrb[33].mxu0 }
 0x34f   :  { %v759_v49 = vadd.f32 %v758_v61, %v718_v58  ;;  %v760_v62 = vpop.f32.mrb[34].mxu0 }
 0x350   :  { %v763_v50 = vsub.f32 0.0, %v757_v60  ;;  %v761_v63 = vpop.f32.mrb[35].mxu0 }
 0x351   :  { %v764_v0 = vsub.f32 0.0, %v759_v49 }
 0x352   :  { %v765_v51 = vmul.f32 1.442695, %v763_v50 }
 0x353   :  { %v767_v1 = vmul.f32 1.442695, %v764_v0 }
 0x354   :  { %1028 = vpow2.f32 %v765_v51 }
 0x355   :  { %1030 = vpow2.f32 %v767_v1 }
 0x35e   :  { %v1029_v2 = vpop.eup %1028 }
 0x35f   :  { %v1031_v3 = vpop.eup %1030  ;;  %v769_v4 = vadd.f32 1.0, %v1029_v2 }
 0x360   :  { %v770_v5 = vadd.f32 1.0, %v1031_v3 }
 0x361   :  { %1032 = vrcp.f32 %v769_v4 }
 0x362   :  { %1034 = vrcp.f32 %v770_v5 }
 0x36b   :  { %v1033_v8 = vpop.eup %1032 }
 0x36c   :  { %v1035_v10 = vpop.eup %1034 }
 0x36d   :  { %v775_v11 = vcombine.low %v1033_v8, %v1035_v10 }
 0x36f   :  { %v782_v12 = vrot.slane %v775_v11, %v781_v9 }
 0x371   :  { %v789_v13 = vrot.slane %v782_v12, %v781_v9 }
 0x373   :  { %795 = vst.msk [vmem:[#allocation3] sm:$0x3] %vm793_vm2, %v789_v13 }
 0x374   :  { %800 = vsyncadd [#allocation4], 16  ;;  %s1062_s5 = smov [#allocation3]  }
 0x375   :  { %s802_s29 = sshll.u32 %s1062_s5, 4  ;;  %s803_s29 = int_to_ptr.vmem [resolvable:$true] %s802_s29 }
 0x376   :  { %s1036_s30 = scalar_lea.vmem %s803_s29, 16  ;;  %s1040_s8 = scalar_lea.vmem %s803_s29, 32 }
 0x377   :  { %p1037_p0 = scmp.ne.s32.totalorder %s803_s29, %s1036_s30  ;;  %p1041_p1 = scmp.lt.s32.totalorder %s803_s29, %s803_s29 }
 0x378   :  { %p1042_p2 = scmp.lt.s32.totalorder %s1040_s8, %s1036_s30 }
 0x37a   :  { %p1043_p3 = por %p1042_p2, %p1041_p1 }
 0x37c   :  { %p1044_p4 = pnand %p1043_p3, %p1037_p0 }
 0x37e   :  { %1047 = shalt.err (!%p1044_p4)
}
 0x37f   :  { %s1048_s6 = scalar_lea.hbm %s1364_s7, 16 }
 0x380   :  { %p1049_p5 = scmp.ne.s32.totalorder %s1364_s7, %s1048_s6  ;;  %p1052_p6 = scmp.lt.u32.totalorder %s1048_s6, %s1364_s7 }
 0x382   :  { %p1054_p7 = pnand %p1052_p6, %p1049_p5 }
 0x384   :  { %1057 = shalt.err (!%p1054_p7)
}
 0x385   :  { %805 = dma.vmem_to_hbm [thread:$0]  %s803_s29, 16, %s1364_s7, [#allocation4]  }
 0x386   :  { %1058 = dma.done.wait [#allocation4], 32  }
 0x387   :  { %1059 = vsyncadd [#allocation4], 4294967264 }
 0x388   :  { %809 = vsyncpa [#allocation4], 1 }

</bundles_post_ra>
